<compile_context>
chip_gen: v5e
topology: v5e:2x2
jax: 0.10.0
libtpu: 0.0.40
codegen_flags: <defaults>
</compile_context>

<pallas_src>
import functools

import jax
import jax.numpy as jnp
from jax.experimental import pallas as pl
from jax.experimental.pallas import tpu as pltpu


# ----------------------------------------------------------------------------- kernels
def _ffn_core(x_ref, w1t_ref, b1_ref, w2t_ref, compute_dtype):
    """relu(x @ W1^T + b1) @ W2^T for the current (row-tile, hidden-chunk)."""
    x = x_ref[...]
    w1t = w1t_ref[...]
    w2t = w2t_ref[...]
    if compute_dtype is not None:
        # bf16 (etc.) MXU operands; accumulation stays f32 via preferred_element_type.
        x = x.astype(compute_dtype)
        w1t = w1t.astype(compute_dtype)
        w2t = w2t.astype(compute_dtype)
    # Pre-transposed weights -> canonical contraction, no in-kernel XLU transpose.
    h = jnp.dot(x, w1t, preferred_element_type=jnp.float32)
    h = jnp.maximum(h + b1_ref[...].astype(jnp.float32), 0.0)
    # h is fed to the MXU in the weight/compute dtype (exact for f32; documented slight
    # deviation from a pure-f32 intermediate when bf16 operands are requested).
    return jnp.dot(h.astype(w2t.dtype), w2t, preferred_element_type=jnp.float32)


def _ffn_resident_kernel(x_ref, w1t_ref, b1_ref, w2t_ref, b2_ref, o_ref, *, compute_dtype):
    # Single-pass: weights/biases are VMEM-resident (constant block index), no grid
    # reduction axis, no accumulator, no init/finalize branches.
    y = _ffn_core(x_ref, w1t_ref, b1_ref, w2t_ref, compute_dtype)
    y = jnp.maximum(y + b2_ref[...].astype(jnp.float32), 0.0)
    o_ref[...] = y.astype(o_ref.dtype)


def _ffn_tiled_direct_kernel(x_ref, w1t_ref, b1_ref, w2t_ref, b2_ref, o_ref, *, compute_dtype):
    # f32 output: o_ref doubles as the accumulator — its block index is constant over
    # the k (hidden) axis so the block stays resident in VMEM across the reduction.
    k = pl.program_id(1)
    part = _ffn_core(x_ref, w1t_ref, b1_ref, w2t_ref, compute_dtype)

    @pl.when(k == 0)
    def _init():
        o_ref[...] = part

    @pl.when(k != 0)
    def _accum():
        o_ref[...] += part

    @pl.when(k == pl.num_programs(1) - 1)
    def _finalize():
        o_ref[...] = jnp.maximum(o_ref[...] + b2_ref[...].astype(jnp.float32), 0.0)


def _ffn_tiled_acc_kernel(x_ref, w1t_ref, b1_ref, w2t_ref, b2_ref, o_ref, acc_ref, *, compute_dtype):
    # Non-f32 output: accumulate in an f32 VMEM scratch, single cast at the store.
    k = pl.program_id(1)

    @pl.when(k == 0)
    def _init():
        acc_ref[...] = jnp.zeros_like(acc_ref)

    acc_ref[...] += _ffn_core(x_ref, w1t_ref, b1_ref, w2t_ref, compute_dtype)

    @pl.when(k == pl.num_programs(1) - 1)
    def _finalize():
        y = jnp.maximum(acc_ref[...] + b2_ref[...].astype(jnp.float32), 0.0)
        o_ref[...] = y.astype(o_ref.dtype)


# ----------------------------------------------------------------------------- helpers
def _round_up(v, m):
    return (v + m - 1) // m * m


def _vmem_capacity_bytes():
    try:
        cap = getattr(pltpu.get_tpu_info(), "vmem_capacity_bytes", None)
        if cap:
            return int(cap)
    except Exception:
        pass
    return 64 * 1024 * 1024  # conservative default: v7x per-TC VMEM


def _pick_th(H, cap=512):
    """Hidden-chunk size for the tiled fallback: a lane-aligned divisor of H (or pad H)."""
    if H <= cap:
        return H, H
    for t in range(cap, 0, -128):  # 512, 384, 256, 128 — all multiples of 128
        if H % t == 0:
            return t, H
    # Rare ragged case: pad H once to a multiple of `cap` (exact: padded hidden units
    # have zero weights and zero bias -> h = relu(0) = 0 -> contribute nothing).
    return cap, _round_up(H, cap)


def prepare_ffn_params(w1, b1, w2, b2):
    """One-time layout prep (outside the hot path).

    PyTorch nn.Linear layouts w1:[filter, in], w2:[out, filter] are pre-transposed to
    W1^T:[in, filter] and W2^T:[filter, out] so the kernel's dots use the canonical
    contraction (no per-step transpose); biases become (1, N) rows.
    """
    return w1.T, b1.reshape(1, -1), w2.T, b2.reshape(1, -1)


# ----------------------------------------------------------------------------- wrapper
def positionwise_feed_forward(x, w1t, b1r, w2t, b2r, *, compute_dtype=None):
    """x: [B, S, D]; w1t: [D, H]; b1r: [1, H]; w2t: [H, O]; b2r: [1, O]
    (pre-transposed layouts from prepare_ffn_params)."""
    B, S, D = x.shape
    H = w1t.shape[1]
    O = w2t.shape[1]
    M = B * S
    x2 = x.reshape(M, D)
    out_dtype = x.dtype

    x_b = jnp.dtype(x.dtype).itemsize
    w_b = jnp.dtype(w1t.dtype).itemsize
    o_b = jnp.dtype(out_dtype).itemsize
    c_b = jnp.dtype(compute_dtype).itemsize if compute_dtype is not None else 0
    out_is_f32 = jnp.dtype(out_dtype) == jnp.dtype(jnp.float32)

    vmem_budget = int(0.75 * _vmem_capacity_bytes())  # headroom for Mosaic scratch

    def budget(tm_, th_, resident):
        w_blk = (D * th_ + th_ + th_ * O + O) * w_b * 2       # default double-buffering
        io = 2 * tm_ * D * x_b + 2 * tm_ * O * o_b            # double-buffered x / out tiles
        inter = tm_ * th_ * 4 + tm_ * O * 4                   # f32 h and y/partial
        if (not resident) and not out_is_f32:
            inter += tm_ * O * 4                              # f32 accumulator scratch
        inter += c_b * (tm_ * D + D * th_ + th_ * O)          # casted operand copies
        return w_blk + io + inter

    # --- row tile -------------------------------------------------------------------
    if M <= 1024:
        # Guarantee >=2 steps on the 'parallel' row axis: v7x has 2 TensorCores and
        # megacore sharding only helps when the axis has at least 2 steps.
        tm = min(M, _round_up(pl.cdiv(M, 2), 8))
    else:
        tm = 1024  # large tiles amortize the ~0.35us/step grid overhead (v5e/v6e 128 MiB)
    while tm > 8 and budget(tm, min(H, 512), False) > vmem_budget:
        tm = max(8, _round_up(tm // 2, 8))

    # --- path selection ---------------------------------------------------------------
    use_resident = budget(tm, H, True) <= vmem_budget

    if use_resident:
        grid = (pl.cdiv(M, tm),)
        kernel = functools.partial(_ffn_resident_kernel, compute_dtype=compute_dtype)
        in_specs = [
            pl.BlockSpec((tm, D), lambda i: (i, 0)),   # x row tile
            pl.BlockSpec((D, H), lambda i: (0, 0)),    # W1^T  (resident: DMA'd once)
            pl.BlockSpec((1, H), lambda i: (0, 0)),    # b1    (resident)
            pl.BlockSpec((H, O), lambda i: (0, 0)),    # W2^T  (resident)
            pl.BlockSpec((1, O), lambda i: (0, 0)),    # b2    (resident)
        ]
        out_specs = pl.BlockSpec((tm, O), lambda i: (i, 0))
        scratch_shapes = []
        dim_sem = ("parallel",)
        tile_bytes = budget(tm, H, True)
    else:
        th, Hp = _pick_th(H)
        if Hp != H:
            # Rare ragged hidden dim: zero-pad once so every k block is full (exact).
            w1t = jnp.pad(w1t, ((0, 0), (0, Hp - H)))
            b1r = jnp.pad(b1r, ((0, 0), (0, Hp - H)))
            w2t = jnp.pad(w2t, ((0, Hp - H), (0, 0)))
        grid = (pl.cdiv(M, tm), Hp // th)
        if out_is_f32:
            kernel = functools.partial(_ffn_tiled_direct_kernel, compute_dtype=compute_dtype)
            scratch_shapes = []
        else:
            kernel = functools.partial(_ffn_tiled_acc_kernel, compute_dtype=compute_dtype)
            scratch_shapes = [pltpu.VMEM((tm, O), jnp.float32)]
        in_specs = [
            pl.BlockSpec((tm, D), lambda i, k: (i, 0)),   # x row tile (resident over k)
            pl.BlockSpec((D, th), lambda i, k: (0, k)),   # W1^T hidden chunk
            pl.BlockSpec((1, th), lambda i, k: (0, k)),   # b1 hidden chunk
            pl.BlockSpec((th, O), lambda i, k: (k, 0)),   # W2^T hidden chunk
            pl.BlockSpec((1, O), lambda i, k: (0, 0)),    # b2
        ]
        out_specs = pl.BlockSpec((tm, O), lambda i, k: (i, 0))
        dim_sem = ("parallel", "arbitrary")
        tile_bytes = budget(tm, th, False)

    vmem_limit = int(min(max(tile_bytes * 5 // 4, 8 * 1024 * 1024), vmem_budget))

    out = pl.pallas_call(
        kernel,
        out_shape=jax.ShapeDtypeStruct((M, O), out_dtype),
        grid_spec=pltpu.PrefetchScalarGridSpec(
            num_scalar_prefetch=0,
            grid=grid,
            in_specs=in_specs,
            out_specs=out_specs,
            scratch_shapes=scratch_shapes,
        ),
        compiler_params=pltpu.CompilerParams(
            dimension_semantics=dim_sem,
            vmem_limit_bytes=vmem_limit,
        ),
    )(x2, w1t, b1r, w2t, b2r)

    return out.reshape(B, S, O)


# ----------------------------------------------------------------------------- main
if __name__ == "__main__":
    # Small shapes consistent with the module's forward (B*S rows through the FFN).
    batch, seq = 2, 8
    input_depth, filter_size, output_depth = 32, 64, 32

    key = jax.random.PRNGKey(0)
    kx, k1, k2, k3, k4 = jax.random.split(key, 5)

    x = jax.random.normal(kx, (batch, seq, input_depth), dtype=jnp.float32)

    # Deterministic parameter init mimicking nn.Linear's uniform(-1/sqrt(in), 1/sqrt(in)).
    lim1 = 1.0 / (input_depth ** 0.5)
    lim2 = 1.0 / (filter_size ** 0.5)
    w1 = jax.random.uniform(k1, (filter_size, input_depth), jnp.float32, -lim1, lim1)
    b1 = jax.random.uniform(k2, (filter_size,), jnp.float32, -lim1, lim1)
    w2 = jax.random.uniform(k3, (output_depth, filter_size), jnp.float32, -lim2, lim2)
    b2 = jax.random.uniform(k4, (output_depth,), jnp.float32, -lim2, lim2)

    # One-time layout prep (pre-transpose), then the fused kernel.
    w1t, b1r, w2t, b2r = prepare_ffn_params(w1, b1, w2, b2)

    out = positionwise_feed_forward(x, w1t, b1r, w2t, b2r)
    out = jax.block_until_ready(out)

    # Pure-JAX reference (same math as the PyTorch forward, incl. the trailing ReLU).
    ref = jnp.maximum(x @ w1.T + b1, 0.0)
    ref = jnp.maximum(ref @ w2.T + b2, 0.0)
    assert out.shape == (batch, seq, output_depth)
    assert jnp.allclose(out, ref, atol=1e-5, rtol=1e-5)

    # Optional bf16-operand MXU path (v6e/v7x optimization); f32 accumulation, so only
    # operand-rounding error vs. the f32 reference.
    out_bf16 = positionwise_feed_forward(x, w1t, b1r, w2t, b2r, compute_dtype=jnp.bfloat16)
    out_bf16 = jax.block_until_ready(out_bf16)
    assert jnp.allclose(out_bf16, ref, atol=5e-2, rtol=5e-2)

    print("KERNEL_OK")
</pallas_src>

<mosaic_0001>
module attributes {stable_mosaic.version = 11 : i64} {
  func.func @_ffn_resident_kernel(%arg0: i32, %arg1: memref<8x32xf32, #tpu.memory_space<vmem>>, %arg2: memref<32x64xf32, #tpu.memory_space<vmem>>, %arg3: memref<1x64xf32, #tpu.memory_space<vmem>>, %arg4: memref<64x32xf32, #tpu.memory_space<vmem>>, %arg5: memref<1x32xf32, #tpu.memory_space<vmem>>, %arg6: memref<8x32xf32, #tpu.memory_space<vmem>>) attributes {dimension_semantics = [#tpu.dimension_semantics<parallel>], iteration_bounds = array<i64: 2>, scalar_prefetch = 0 : i64, scratch_operands = 0 : i64, tpu.core_type = #tpu.core_type<tc>, window_params = [{transform_indices = @transform_0, window_bounds = array<i64: 8, 32>}, {pipeline_mode = #tpu.pipeline_mode<synchronous>, transform_indices = @transform_1, window_bounds = array<i64: 32, 64>}, {pipeline_mode = #tpu.pipeline_mode<synchronous>, transform_indices = @transform_2, window_bounds = array<i64: 1, 64>}, {pipeline_mode = #tpu.pipeline_mode<synchronous>, transform_indices = @transform_3, window_bounds = array<i64: 64, 32>}, {pipeline_mode = #tpu.pipeline_mode<synchronous>, transform_indices = @transform_4, window_bounds = array<i64: 1, 32>}, {transform_indices = @transform_5, window_bounds = array<i64: 8, 32>}]} {
    %c0 = arith.constant 0 : index
    %c0_0 = arith.constant 0 : index
    %0 = vector.load %arg1[%c0, %c0_0] : memref<8x32xf32, #tpu.memory_space<vmem>>, vector<8x32xf32>
    %c0_1 = arith.constant 0 : index
    %c0_2 = arith.constant 0 : index
    %1 = vector.load %arg2[%c0_1, %c0_2] : memref<32x64xf32, #tpu.memory_space<vmem>>, vector<32x64xf32>
    %c0_3 = arith.constant 0 : index
    %c0_4 = arith.constant 0 : index
    %2 = vector.load %arg4[%c0_3, %c0_4] : memref<64x32xf32, #tpu.memory_space<vmem>>, vector<64x32xf32>
    %cst = arith.constant dense<0.000000e+00> : vector<8x64xf32>
    %3 = tpu.matmul %0, %1, %cst {dimension_numbers = #tpu.dot_dimension_numbers<[1], [0], [0], [1], [0, 0, 1, 1], [], []>} : vector<8x32xf32>, vector<32x64xf32>, vector<8x64xf32> -> vector<8x64xf32>
    %c0_5 = arith.constant 0 : index
    %c0_6 = arith.constant 0 : index
    %4 = vector.load %arg3[%c0_5, %c0_6] : memref<1x64xf32, #tpu.memory_space<vmem>>, vector<1x64xf32>
    %5 = vector.broadcast %4 : vector<1x64xf32> to vector<8x64xf32>
    %6 = arith.addf %3, %5 : vector<8x64xf32>
    %cst_7 = arith.constant 0.000000e+00 : f32
    %7 = vector.broadcast %cst_7 : f32 to vector<8x64xf32>
    %8 = arith.maximumf %6, %7 : vector<8x64xf32>
    %cst_8 = arith.constant dense<0.000000e+00> : vector<8x32xf32>
    %9 = tpu.matmul %8, %2, %cst_8 {dimension_numbers = #tpu.dot_dimension_numbers<[1], [0], [0], [1], [0, 0, 1, 1], [], []>} : vector<8x64xf32>, vector<64x32xf32>, vector<8x32xf32> -> vector<8x32xf32>
    %c0_9 = arith.constant 0 : index
    %c0_10 = arith.constant 0 : index
    %10 = vector.load %arg5[%c0_9, %c0_10] : memref<1x32xf32, #tpu.memory_space<vmem>>, vector<1x32xf32>
    %11 = vector.broadcast %10 : vector<1x32xf32> to vector<8x32xf32>
    %12 = arith.addf %9, %11 : vector<8x32xf32>
    %cst_11 = arith.constant 0.000000e+00 : f32
    %13 = vector.broadcast %cst_11 : f32 to vector<8x32xf32>
    %14 = arith.maximumf %12, %13 : vector<8x32xf32>
    %c0_12 = arith.constant 0 : index
    %c0_13 = arith.constant 0 : index
    %15 = vector.load %arg6[%c0_12, %c0_13] : memref<8x32xf32, #tpu.memory_space<vmem>>, vector<8x32xf32>
    tpu.vector_store %arg6[%c0_12, %c0_13], %14 {strides = array<i32>} : memref<8x32xf32, #tpu.memory_space<vmem>>, vector<8x32xf32>,
    return
  }
  func.func @transform_0(%arg0: i32) -> (i32, i32) {
    %c0_i32 = arith.constant 0 : i32
    %c0_i32_0 = arith.constant 0 : i32
    return %arg0, %c0_i32 : i32, i32
  }
  func.func @transform_1(%arg0: i32) -> (i32, i32) {
    %c0_i32 = arith.constant 0 : i32
    %c0_i32_0 = arith.constant 0 : i32
    %c0_i32_1 = arith.constant 0 : i32
    return %c0_i32, %c0_i32_0 : i32, i32
  }
  func.func @transform_2(%arg0: i32) -> (i32, i32) {
    %c0_i32 = arith.constant 0 : i32
    %c0_i32_0 = arith.constant 0 : i32
    %c0_i32_1 = arith.constant 0 : i32
    return %c0_i32, %c0_i32_0 : i32, i32
  }
  func.func @transform_3(%arg0: i32) -> (i32, i32) {
    %c0_i32 = arith.constant 0 : i32
    %c0_i32_0 = arith.constant 0 : i32
    %c0_i32_1 = arith.constant 0 : i32
    return %c0_i32, %c0_i32_0 : i32, i32
  }
  func.func @transform_4(%arg0: i32) -> (i32, i32) {
    %c0_i32 = arith.constant 0 : i32
    %c0_i32_0 = arith.constant 0 : i32
    %c0_i32_1 = arith.constant 0 : i32
    return %c0_i32, %c0_i32_0 : i32, i32
  }
  func.func @transform_5(%arg0: i32) -> (i32, i32) {
    %c0_i32 = arith.constant 0 : i32
    %c0_i32_0 = arith.constant 0 : i32
    return %arg0, %c0_i32 : i32, i32
  }
}

</mosaic_0001>

<bundles_post_ra>
// kernel: tpu_custom_call.1
= control target key start
LH: loop header
LB: loop body
LE: loop exit
PB: predicated region body
PF: predicated region fallthrough
CT: control target
= control target key end

     0   :  { %10 = vsyncpa [#allocation3], 0  ;;  %s643_s0 = inlined_call_operand.vmem [shape: f32[16,32], index: 0, kind: input, shape index: {}]   ;;  %s644_s1 = inlined_call_operand.vmem [shape: f32[32,64], index: 1, kind: input, shape index: {}]   ;;  %s645_s2 = inlined_call_operand.vmem [shape: f32[1,64], index: 2, kind: input, shape index: {}]   ;;  %s646_s3 = inlined_call_operand.vmem [shape: f32[64,32], index: 3, kind: input, shape index: {}]   ;;  %s647_s4 = inlined_call_operand.vmem [shape: f32[1,32], index: 4, kind: input, shape index: {}]   ;;  %s648_s5 = inlined_call_operand.hbm [shape: f32[16,32], index: 5, kind: output, shape index: {}]  }
   0x1   :  { %12 = vsyncpa [#allocation3 + $0x1], 0  ;;  %s514_s18 = smov 0   ;;  %s516_s19 = smov 0  }
   0x2   :  { %s518_s20 = smov 0   ;;  %s520_s21 = smov 0  }
   0x3 LB: > { %s535_s22 = sadd.s32 4294967295, %s482_s21   ;;  %s367_s23 = sadd.s32 4294967294, %s482_s21   ;;  %s482_s21 = sphi %s520_s21, %s654_s21   ;;  %s478_s20 = sphi %s518_s20, %s653_s20   ;;  %s474_s19 = sphi %s516_s19, %s652_s19   ;;  %s470_s18 = sphi %s514_s18, %s651_s18  }
   0x4   : > { %s539_s24 = sadd.s32 1, %s482_s21   ;;  %s135_s25 = sadd.s32 1, %s478_s20 }
   0x5   : > { %s132_s26 = ssub.s32 %s482_s21, %s539_s24  ;;  %p145_p0 = scmp.ne.s32.totalorder %s478_s20, %s474_s19 }
   0x6   : > { %p133_p1 = scmp.eq.s32.totalorder %s132_s26, 0  ;;  %p146_p2 = scmp.eq.s32.totalorder %s535_s22, 1 }
   0x7   : > { %p151_p3 = scmp.ne.s32.totalorder %s474_s19, %s470_s18  ;;  %p152_p4 = scmp.eq.s32.totalorder %s367_s23, 1 }
   0x8   : > { %s550_s27 = scalar_select %p133_p1, %s478_s20, %s135_s25  }
   0x9   : > { %p552_p5 = por %p146_p2, %p145_p0  ;;  %p556_p6 = por %p152_p4, %p151_p3 }
   0xa   : > { %p370_p7 = scmp.ge.s32.totalorder %s482_s21, 1  ;;  %p189_p8 = scmp.lt.s32.totalorder %s482_s21, 3 }
   0xc   : > { %p190_p9 = pnand %p370_p7, %p189_p8 }
   0xd   : > { %p216_p10 = scmp.lt.s32.totalorder (!%p190_p9), %s535_s22, 1  ;;  %s376_s6 = sshll.u32 (!%p190_p9), %s535_s22, 3 }
   0xe   : > { %193 = sbr.rel (%p190_p9) target bundleno = 290 (0x122), region = 40  ;;  %s303_s11 = scalar_lea.hbm (!%p190_p9), %s648_s5, %s376_s6 }
   0xf   : > { %s307_s14 = sshll.u32 (!%p190_p9), %s303_s11, 4  ;;  %s440_s25 = scalar_lea.hbm (!%p190_p9), %s648_s5, 16  ;;  %s308_s14 = int_to_ptr.hbm [resolvable:$true] %s307_s14 }
  0x13   : > { %v224_v0 = vld [vmem:[%s644_s1 + $0x18] sm:$0xff]  ;;  %v223_v1 = vld [vmem:[%s644_s1 + $0x10] sm:$0xff]  ;;  %v222_v4 = vld [vmem:[%s644_s1 + $0x8] sm:$0xff]  ;;  %s217_s15 = scalar_select %p216_p10, %s535_s22, 1  ;;  %vm237_vm0 = vcmask 261120   ;;  %vm266_vm1 = vcmask 523264  }
  0x14   : > { %253 = vmatpush.msra.mxu0 %v224_v0  ;;  %v232_v2 = vld [vmem:[%s646_s3 + $0x38] sm:$0xff]  ;;  %v231_v3 = vld [vmem:[%s646_s3 + $0x30] sm:$0xff]  ;;  %v230_v5 = vld [vmem:[%s646_s3 + $0x28] sm:$0xff] }
  0x15   : > { %278 = vmatpush.msra.mxu1 %v232_v2  ;;  %v221_v6 = vld [vmem:[%s644_s1] sm:$0xff]  ;;  %s372_s26 = sshll.u32 %s217_s15, 3  ;;  %v228_v9 = vld [vmem:[%s646_s3 + $0x18] sm:$0xff]  ;;  %v227_v10 = vld [vmem:[%s646_s3 + $0x10] sm:$0xff]  ;;  %s434_s15 = sshra.s32 %s308_s14, 4  ;;  %s435_s15 = int_to_ptr.hbm [resolvable:$true] %s434_s15 }
  0x16   : > { %254 = vmatpush.msra.mxu0 %v223_v1  ;;  %s219_s7 = scalar_lea.vmem %s643_s0, %s372_s26  ;;  %v229_v7 = vld [vmem:[%s646_s3 + $0x20] sm:$0xff]  ;;  %v226_v11 = vld [vmem:[%s646_s3 + $0x8] sm:$0xff]  ;;  %s213_s26 = sand.u32 1, %s474_s19  }
  0x17   : > { %279 = vmatpush.msra.mxu1 %v231_v3  ;;  %v220_v8 = vld [vmem:[%s219_s7] sm:$0xff]  ;;  %s371_s30 = sshll.u32 %s213_s26, 3  ;;  %s293_s22 = scalar_lea.sflag [#allocation3], %s213_s26 }
  0x18   : > { %255 = vmatpush.msra.mxu0 %v222_v4  ;;  %v225_v12 = vld [vmem:[%s646_s3] sm:$0xff]  ;;  %s215_s12 = scalar_lea.vmem [#allocation2], %s371_s30  ;;  %s436_s16 = scalar_lea.hbm %s435_s15, 8 }
  0x19   : > { %280 = vmatpush.msra.mxu1 %v230_v5  ;;  %v418_v13 = vld [vmem:[%s645_s2] ss:$0 sm:$0xff]  ;;  %s305_s13 = sshll.u32 %s215_s12, 4  ;;  %p437_p11 = scmp.ne.s32.totalorder %s435_s15, %s436_s16  ;;  %s306_s13 = int_to_ptr.vmem [resolvable:$true] %s305_s13 }
  0x1a   : > { %256 = vmatpush.msra.mxu0 %v221_v6  ;;  %v419_v17 = vld [vmem:[%s647_s4] ss:$0 sm:$0xff]  ;;  %p441_p0 = scmp.lt.s32.totalorder %s435_s15, %s648_s5  ;;  %p442_p1 = scmp.lt.s32.totalorder %s440_s25, %s436_s16 }
  0x1b   : > { %373 = vmatmul.msk.f32.vlgmr.msra.gmra.mxu0 %vm237_vm0, %v220_v8  ;;  %281 = vmatpush.msra.mxu1 %v229_v7  ;;  %p438_p12 = pnand %p437_p11, %p552_p5 }
  0x1c   : > { %p443_p2 = por %p442_p1, %p441_p0 }
  0x1d   : > { %282 = vmatpush.msra.mxu1 %v228_v9  ;;  %p439_p13 = pneg %p438_p12 }
  0x1f   : > { %283 = vmatpush.msra.mxu1 %v227_v10  ;;  %p444_p3 = pnand %p443_p2, %p439_p13 }
  0x21   : > { %284 = vmatpush.msra.mxu1 %v226_v11 }
  0x23   : > { %285 = vmatpush.msra.mxu1 %v225_v12 }
  0x98   : > { %v258_v14 = vpop.f32.mrf.mxu0 }
  0x99   : > { %v259_v15 = vadd.f32 %v418_v13, %v258_v14 }
  0x9b   : > { %v261_v16 = vmax.f32 %v259_v15, 0.0 }
  0x9d   : > { %374 = vmatmul.msk.f32.vlgmr.msra.gmra.mxu1 %vm266_vm1, %v261_v16 }
 0x11a   : > { %v287_v18 = vpop.f32.mrf.mxu1 }
 0x11b   : > { %v288_v19 = vadd.f32 %v419_v17, %v287_v18 }
 0x11d   : > { %v290_v20 = vmax.f32 %v288_v19, 0.0 }
 0x11f   : > { %291 = vst.msk [vmem:[%s215_s12] sm:$0xff] %vm237_vm0, %v290_v20 }
 0x120   : > { %447 = shalt.err (!%p444_p3)
}
 0x121   : > { %379 = dma.vmem_to_hbm [thread:$0]  (%p552_p5), %s306_s13, 128, %s308_s14, %s293_s22  }
 0x122 PF: > { %p385_p4 = scmp.ge.s32.totalorder %s482_s21, 2  ;;  %s319_s26 = sand.u32 1, %s470_s18  }
 0x123   : > { %s320_s7 = scalar_lea.sflag [#allocation3], %s319_s26 }
 0x124   : > { %p382_p7 = pnand %p385_p4, %p556_p6 }
 0x126   : > { %p383_p8 = pneg %p382_p7 }
 0x128   : > { %465 = dma.done.wait (%p383_p8), %s320_s7, 128  }
 0x129   : > { %467 = vsyncadd (%p383_p8), %s320_s7, 4294967168  ;;  %p15_p9 = scmp.ge.s32.totalorder %s539_s24, 4   ;;  %s651_s18 = smov %s474_s19 }
 0x12a   : > { %s652_s19 = smov %s478_s20  ;;  %s653_s20 = smov %s550_s27 }
 0x12b   : > { %s654_s21 = smov %s539_s24  ;;  %17 = sbr.rel (!%p15_p9) target bundleno = 3 (0x3), region = 75 }
 0x130   :  { %326 = vsyncpa [#allocation3], 1 }
 0x131   :  { %328 = vsyncpa [#allocation3 + $0x1], 1 }

</bundles_post_ra>
